<compile_context>
chip_gen: v5e
topology: v5e:2x2
jax: 0.10.0
libtpu: 0.0.40
codegen_flags: <defaults>
</compile_context>

<pallas_src>
import functools

import jax
import jax.numpy as jnp
from jax import lax
from jax.experimental import pallas as pl
from jax.experimental.pallas import tpu as pltpu


# Below this hidden dim the two heads share one fused block-diagonal layer-2
# matmul (everything is below a single MXU tile anyway); at/above it we use two
# real (H, H) matmuls on free lane slices at multiples of 128.
_SPLIT_HIDDEN_DIM = 128


# ----------------------------------------------------------------------------
# Kernel
# ----------------------------------------------------------------------------
def _double_q_kernel(obs_ref, act_ref,
                     w1o_ref, w1a_ref, b1_ref,
                     w2_ref, b2_ref,
                     w3t_ref, b3_ref,
                     out_ref,
                     *, split_heads, hidden_dim):
    """Fused forward of both Q heads for one (TB, *) batch tile.

    h1  = relu(obs @ W1_obs + act @ W1_act + b1)    # (TB, 2H), both heads
    h2  = relu(h1 @ W2 + b2)                        # (TB, 2H)
    out = W3t contracted with h2 (transposed)       # (2, TB): row0=q1, row1=q2
    """
    wdt = w1o_ref.dtype
    obs = obs_ref[...].astype(wdt)
    act = act_ref[...].astype(wdt)

    # Layer 1 (obs/action split replaces the wrapper-side concat).
    h = (jnp.dot(obs, w1o_ref[...], preferred_element_type=jnp.float32)
         + jnp.dot(act, w1a_ref[...], preferred_element_type=jnp.float32)
         + b1_ref[...])
    h = jnp.maximum(h, 0.0).astype(wdt)

    # Layer 2.
    if split_heads:
        # w2_ref is (2, H, H): two real per-head matmuls, no zero-block work.
        H = hidden_dim
        h2a = (jnp.dot(h[:, :H], w2_ref[0], preferred_element_type=jnp.float32)
               + b2_ref[:, :H])
        h2b = (jnp.dot(h[:, H:], w2_ref[1], preferred_element_type=jnp.float32)
               + b2_ref[:, H:])
        h2 = jnp.concatenate([jnp.maximum(h2a, 0.0), jnp.maximum(h2b, 0.0)],
                             axis=-1).astype(wdt)
    else:
        # w2_ref is (2H, 2H) block-diagonal: heads stay independent.
        h2 = jnp.dot(h, w2_ref[...], preferred_element_type=jnp.float32) + b2_ref[...]
        h2 = jnp.maximum(h2, 0.0).astype(wdt)

    # Layer 3, transposed: out[i, t] = sum_k w3t[i, k] * h2[t, k]
    # -> lane-dense (2, TB) output tile, single unmasked store.
    q_t = lax.dot_general(w3t_ref[...], h2,
                          dimension_numbers=(((1,), (1,)), ((), ())),
                          preferred_element_type=jnp.float32)
    out_ref[...] = (q_t + b3_ref[...]).astype(out_ref.dtype)


# ----------------------------------------------------------------------------
# Wrapper
# ----------------------------------------------------------------------------
def _round_up(x, m):
    return ((x + m - 1) // m) * m


def _pick_batch_tile(batch):
    """Batch-tile size.

    * Small batches: one block (no grid-loop overhead at all).
    * Large batches: a big tile (fixed ~0.35us per-grid-step cost dominates at
      these tiny feature dims), but always >= 2 grid steps so the parallel
      batch axis can shard across both v7x TensorCores; rounded to a multiple
      of 128 so the lane-dense (2, TB) output block stays layout-legal when
      the grid has more than one step; capped at 2048 rows.
    """
    if batch < 256:
        return batch
    return min(2048, _round_up(pl.cdiv(batch, 2), 128))


@jax.jit
def double_q_critic_forward(obs, action, params):
    """Pallas-backed DoubleQCritic.forward(obs, action) -> (q1, q2)."""
    assert obs.ndim == 2 and action.ndim == 2
    assert obs.shape[0] == action.shape[0]
    B, obs_dim = obs.shape
    act_dim = action.shape[1]
    w1o, w1a, b1, w2, b2, w3t, b3 = params

    split_heads = (w2.ndim == 3)          # (2, H, H) vs (2H, 2H); static
    two_h = b1.shape[1]
    hidden_dim = two_h // 2
    in_dim = obs_dim + act_dim

    tb = _pick_batch_tile(B)
    grid = (pl.cdiv(B, tb),)

    def _resident(x):
        # Same block every grid step -> stays VMEM-resident (no re-DMA).
        n = x.ndim
        return pl.BlockSpec(x.shape, lambda i, n=n: (0,) * n)

    # Advisory cost estimate (this call is sub-microsecond; tell XLA so).
    l2_flops = (2 * B * 2 * hidden_dim * hidden_dim if split_heads
                else 2 * B * two_h * two_h)
    flops = 2 * B * in_dim * two_h + l2_flops + 2 * B * two_h * 2
    param_bytes = sum(int(p.size) * p.dtype.itemsize for p in params)
    bytes_accessed = (B * obs_dim * obs.dtype.itemsize
                      + B * act_dim * action.dtype.itemsize
                      + param_bytes + B * 2 * 4)
    cost = pl.CostEstimate(flops=flops, transcendentals=0,
                           bytes_accessed=bytes_accessed)

    # Explicit VMEM budget: resident weights (x2 buffering) + double-buffered
    # activation tiles + layer intermediates + output + slack.  Only override
    # the scoped default when actually needed; stay under v7x's 64 MiB VMEM.
    act_tile_bytes = tb * (obs_dim * obs.dtype.itemsize
                           + act_dim * action.dtype.itemsize)
    h_tile_bytes = tb * two_h * 4
    out_tile_bytes = tb * 2 * 4
    vmem_need = (2 * param_bytes + 2 * act_tile_bytes + 4 * h_tile_bytes
                 + 2 * out_tile_bytes + (2 << 20))
    vmem_limit = None if vmem_need <= (16 << 20) else min(vmem_need, 48 << 20)

    kernel = functools.partial(_double_q_kernel,
                               split_heads=split_heads,
                               hidden_dim=hidden_dim)

    out = pl.pallas_call(
        kernel,
        out_shape=jax.ShapeDtypeStruct((2, B), jnp.float32),
        grid=grid,
        in_specs=[
            pl.BlockSpec((tb, obs_dim), lambda i: (i, 0)),
            pl.BlockSpec((tb, act_dim), lambda i: (i, 0)),
            _resident(w1o), _resident(w1a), _resident(b1),
            _resident(w2), _resident(b2),
            _resident(w3t), _resident(b3),
        ],
        out_specs=pl.BlockSpec((2, tb), lambda i: (0, i)),
        compiler_params=pltpu.CompilerParams(
            dimension_semantics=("parallel",),
            vmem_limit_bytes=vmem_limit),
        cost_estimate=cost,
    )(obs, action, w1o, w1a, b1, w2, b2, w3t, b3)

    q1 = out[0].reshape(-1, 1)
    q2 = out[1].reshape(-1, 1)
    return q1, q2


# ----------------------------------------------------------------------------
# Parameter init (orthogonal weights, zero biases — mirrors weight_init)
# ----------------------------------------------------------------------------
def _orthogonal(key, shape):
    """Orthogonal init for a weight stored as (in_features, out_features).

    Mirrors nn.init.orthogonal_ on the torch (out, in) weight, transposed to
    the (in, out) layout used by the kernel (y = x @ W).
    """
    in_f, out_f = shape
    rows, cols = out_f, in_f                        # torch weight is (out, in)
    n_max, n_min = max(rows, cols), min(rows, cols)
    a = jax.random.normal(key, (n_max, n_min), jnp.float32)
    q, r = jnp.linalg.qr(a)
    d = jnp.diagonal(r)
    q = q * jnp.where(d >= 0, 1.0, -1.0)[None, :]   # avoid sign(0) == 0
    w_torch = q if rows >= cols else q.T            # (out, in)
    return w_torch.T                                # (in, out)


def init_double_q_params(key, obs_dim, action_dim, hidden_dim,
                         weight_dtype=jnp.float32):
    """hidden_depth = 2: Linear -> ReLU -> Linear -> ReLU -> Linear(1), x2 heads.

    Returns (fused_params_for_kernel, per_head_params_for_reference).
    weight_dtype=float32 matches the PyTorch module end-to-end; bfloat16 is
    supported (bf16 matmul inputs, f32 accumulation) to cut streaming bytes.
    """
    in_dim = obs_dim + action_dim
    H = hidden_dim
    keys = jax.random.split(key, 6)

    def head(k1, k2, k3):
        return (_orthogonal(k1, (in_dim, H)),
                _orthogonal(k2, (H, H)),
                _orthogonal(k3, (H, 1)))

    w1_a, w2_a, w3_a = head(keys[0], keys[1], keys[2])   # Q1
    w1_b, w2_b, w3_b = head(keys[3], keys[4], keys[5])   # Q2

    # Layer 1: concat heads along output axis, split input axis obs/action.
    w1 = jnp.concatenate([w1_a, w1_b], axis=1)            # (in_dim, 2H)
    w1o, w1act = w1[:obs_dim], w1[obs_dim:]

    # Layer 2: per-head stack when H spans full lane tiles, block-diag otherwise.
    if H >= _SPLIT_HIDDEN_DIM:
        w2 = jnp.stack([w2_a, w2_b], axis=0)               # (2, H, H)
    else:
        w2 = jnp.zeros((2 * H, 2 * H), jnp.float32)
        w2 = w2.at[:H, :H].set(w2_a).at[H:, H:].set(w2_b)  # block-diagonal

    # Layer 3, stored transposed: row 0 -> q1, row 1 -> q2.
    w3t = jnp.zeros((2, 2 * H), jnp.float32)
    w3t = w3t.at[0, :H].set(w3_a[:, 0]).at[1, H:].set(w3_b[:, 0])

    b1 = jnp.zeros((1, 2 * H), jnp.float32)                # zero biases
    b2 = jnp.zeros((1, 2 * H), jnp.float32)
    b3 = jnp.zeros((2, 1), jnp.float32)

    fused = (w1o.astype(weight_dtype), w1act.astype(weight_dtype), b1,
             w2.astype(weight_dtype), b2,
             w3t.astype(weight_dtype), b3)

    heads = ((w1_a, w2_a, w3_a), (w1_b, w2_b, w3_b))
    heads = jax.tree_util.tree_map(lambda w: w.astype(weight_dtype), heads)
    return fused, heads


# ----------------------------------------------------------------------------
# Pure-JAX reference (per-head, mirrors the torch module)
# ----------------------------------------------------------------------------
def _reference_forward(obs, action, heads):
    x = jnp.concatenate([obs, action], axis=-1)

    def head_fwd(w1, w2, w3):
        # Biases are zero-initialised (weight_init), so bias adds are no-ops.
        h = jnp.maximum(jnp.dot(x.astype(w1.dtype), w1,
                                preferred_element_type=jnp.float32), 0.0)
        h = jnp.maximum(jnp.dot(h.astype(w2.dtype), w2,
                                preferred_element_type=jnp.float32), 0.0)
        return jnp.dot(h.astype(w3.dtype), w3, preferred_element_type=jnp.float32)

    (w1_a, w2_a, w3_a), (w1_b, w2_b, w3_b) = heads
    return head_fwd(w1_a, w2_a, w3_a), head_fwd(w1_b, w2_b, w3_b)


# ----------------------------------------------------------------------------
# Demo / self-check
# ----------------------------------------------------------------------------
if __name__ == "__main__":
    key = jax.random.PRNGKey(0)

    # Tolerance covers possible precision differences between the XLA
    # reference matmul path and the in-kernel MXU f32 path (either side may
    # internally use bf16-pass decomposition for f32 dots).  Structural /
    # wiring errors would be orders of magnitude larger than this.
    TOL = dict(atol=2e-2, rtol=2e-2)

    configs = [
        # (obs_dim, action_dim, hidden_dim, batches)
        (24, 8, 32, (8, 1000, 1024)),   # fused block-diagonal path (H < 128);
                                        # 1000 exercises a padded last block
        (24, 8, 256, (8, 384)),         # per-head split path (H >= 128)
    ]
    for obs_dim, action_dim, hidden_dim, batches in configs:
        kp = jax.random.fold_in(key, hidden_dim)
        params, heads = init_double_q_params(kp, obs_dim, action_dim, hidden_dim)

        for batch in batches:
            ko = jax.random.fold_in(kp, 2 * batch)
            ka = jax.random.fold_in(kp, 2 * batch + 1)
            obs = jax.random.normal(ko, (batch, obs_dim), jnp.float32)
            action = jax.random.normal(ka, (batch, act_dim := action_dim), jnp.float32)

            q1, q2 = double_q_critic_forward(obs, action, params)
            jax.block_until_ready((q1, q2))

            r1, r2 = _reference_forward(obs, action, heads)
            assert q1.shape == (batch, 1) and q2.shape == (batch, 1)
            assert jnp.allclose(q1, r1, **TOL), \
                f"q1 mismatch (H={hidden_dim}, batch={batch})"
            assert jnp.allclose(q2, r2, **TOL), \
                f"q2 mismatch (H={hidden_dim}, batch={batch})"

    # TODO(synk): self.outputs bookkeeping / log() (histograms, param logging)
    # is host-side instrumentation with no kernel equivalent; only forward()
    # compute is implemented.
    print("KERNEL_OK")
</pallas_src>

<mosaic_0001>
module attributes {stable_mosaic.version = 11 : i64} {
  func.func @_double_q_kernel(%arg0: i32, %arg1: memref<8x24xf32, #tpu.memory_space<vmem>>, %arg2: memref<8x8xf32, #tpu.memory_space<vmem>>, %arg3: memref<24x64xf32, #tpu.memory_space<vmem>>, %arg4: memref<8x64xf32, #tpu.memory_space<vmem>>, %arg5: memref<1x64xf32, #tpu.memory_space<vmem>>, %arg6: memref<64x64xf32, #tpu.memory_space<vmem>>, %arg7: memref<1x64xf32, #tpu.memory_space<vmem>>, %arg8: memref<2x64xf32, #tpu.memory_space<vmem>>, %arg9: memref<2x1xf32, #tpu.memory_space<vmem>>, %arg10: memref<2x8xf32, #tpu.memory_space<vmem>>) attributes {dimension_semantics = [#tpu.dimension_semantics<parallel>], iteration_bounds = array<i64: 1>, scalar_prefetch = 0 : i64, scratch_operands = 0 : i64, tpu.core_type = #tpu.core_type<tc>, window_params = [{transform_indices = @transform_0, window_bounds = array<i64: 8, 24>}, {transform_indices = @transform_1, window_bounds = array<i64: 8, 8>}, {pipeline_mode = #tpu.pipeline_mode<synchronous>, transform_indices = @transform_2, window_bounds = array<i64: 24, 64>}, {pipeline_mode = #tpu.pipeline_mode<synchronous>, transform_indices = @transform_3, window_bounds = array<i64: 8, 64>}, {pipeline_mode = #tpu.pipeline_mode<synchronous>, transform_indices = @transform_4, window_bounds = array<i64: 1, 64>}, {pipeline_mode = #tpu.pipeline_mode<synchronous>, transform_indices = @transform_5, window_bounds = array<i64: 64, 64>}, {pipeline_mode = #tpu.pipeline_mode<synchronous>, transform_indices = @transform_6, window_bounds = array<i64: 1, 64>}, {pipeline_mode = #tpu.pipeline_mode<synchronous>, transform_indices = @transform_7, window_bounds = array<i64: 2, 64>}, {pipeline_mode = #tpu.pipeline_mode<synchronous>, transform_indices = @transform_8, window_bounds = array<i64: 2, 1>}, {transform_indices = @transform_9, window_bounds = array<i64: 2, 8>}]} {
    %c0 = arith.constant 0 : index
    %c0_0 = arith.constant 0 : index
    %0 = vector.load %arg1[%c0, %c0_0] : memref<8x24xf32, #tpu.memory_space<vmem>>, vector<8x24xf32>
    %c0_1 = arith.constant 0 : index
    %c0_2 = arith.constant 0 : index
    %1 = vector.load %arg2[%c0_1, %c0_2] : memref<8x8xf32, #tpu.memory_space<vmem>>, vector<8x8xf32>
    %c0_3 = arith.constant 0 : index
    %c0_4 = arith.constant 0 : index
    %2 = vector.load %arg3[%c0_3, %c0_4] : memref<24x64xf32, #tpu.memory_space<vmem>>, vector<24x64xf32>
    %cst = arith.constant dense<0.000000e+00> : vector<8x64xf32>
    %3 = tpu.matmul %0, %2, %cst {dimension_numbers = #tpu.dot_dimension_numbers<[1], [0], [0], [1], [0, 0, 1, 1], [], []>} : vector<8x24xf32>, vector<24x64xf32>, vector<8x64xf32> -> vector<8x64xf32>
    %c0_5 = arith.constant 0 : index
    %c0_6 = arith.constant 0 : index
    %4 = vector.load %arg4[%c0_5, %c0_6] : memref<8x64xf32, #tpu.memory_space<vmem>>, vector<8x64xf32>
    %cst_7 = arith.constant dense<0.000000e+00> : vector<8x64xf32>
    %5 = tpu.matmul %1, %4, %cst_7 {dimension_numbers = #tpu.dot_dimension_numbers<[1], [0], [0], [1], [0, 0, 1, 1], [], []>} : vector<8x8xf32>, vector<8x64xf32>, vector<8x64xf32> -> vector<8x64xf32>
    %6 = arith.addf %3, %5 : vector<8x64xf32>
    %c0_8 = arith.constant 0 : index
    %c0_9 = arith.constant 0 : index
    %7 = vector.load %arg5[%c0_8, %c0_9] : memref<1x64xf32, #tpu.memory_space<vmem>>, vector<1x64xf32>
    %8 = vector.broadcast %7 : vector<1x64xf32> to vector<8x64xf32>
    %9 = arith.addf %6, %8 : vector<8x64xf32>
    %cst_10 = arith.constant 0.000000e+00 : f32
    %10 = vector.broadcast %cst_10 : f32 to vector<8x64xf32>
    %11 = arith.maximumf %9, %10 : vector<8x64xf32>
    %c0_11 = arith.constant 0 : index
    %c0_12 = arith.constant 0 : index
    %12 = vector.load %arg6[%c0_11, %c0_12] : memref<64x64xf32, #tpu.memory_space<vmem>>, vector<64x64xf32>
    %cst_13 = arith.constant dense<0.000000e+00> : vector<8x64xf32>
    %13 = tpu.matmul %11, %12, %cst_13 {dimension_numbers = #tpu.dot_dimension_numbers<[1], [0], [0], [1], [0, 0, 1, 1], [], []>} : vector<8x64xf32>, vector<64x64xf32>, vector<8x64xf32> -> vector<8x64xf32>
    %c0_14 = arith.constant 0 : index
    %c0_15 = arith.constant 0 : index
    %14 = vector.load %arg7[%c0_14, %c0_15] : memref<1x64xf32, #tpu.memory_space<vmem>>, vector<1x64xf32>
    %15 = vector.broadcast %14 : vector<1x64xf32> to vector<8x64xf32>
    %16 = arith.addf %13, %15 : vector<8x64xf32>
    %cst_16 = arith.constant 0.000000e+00 : f32
    %17 = vector.broadcast %cst_16 : f32 to vector<8x64xf32>
    %18 = arith.maximumf %16, %17 : vector<8x64xf32>
    %c0_17 = arith.constant 0 : index
    %c0_18 = arith.constant 0 : index
    %19 = vector.load %arg8[%c0_17, %c0_18] : memref<2x64xf32, #tpu.memory_space<vmem>>, vector<2x64xf32>
    %cst_19 = arith.constant dense<0.000000e+00> : vector<2x8xf32>
    %20 = tpu.matmul %19, %18, %cst_19 {dimension_numbers = #tpu.dot_dimension_numbers<[1], [1], [0], [0], [0, 0, 1, 0], [], []>} : vector<2x64xf32>, vector<8x64xf32>, vector<2x8xf32> -> vector<2x8xf32>
    %c0_20 = arith.constant 0 : index
    %c0_21 = arith.constant 0 : index
    %21 = vector.load %arg9[%c0_20, %c0_21] : memref<2x1xf32, #tpu.memory_space<vmem>>, vector<2x1xf32>
    %22 = vector.broadcast %21 : vector<2x1xf32> to vector<2x8xf32>
    %23 = arith.addf %20, %22 : vector<2x8xf32>
    %c0_22 = arith.constant 0 : index
    %c0_23 = arith.constant 0 : index
    %24 = vector.load %arg10[%c0_22, %c0_23] : memref<2x8xf32, #tpu.memory_space<vmem>>, vector<2x8xf32>
    tpu.vector_store %arg10[%c0_22, %c0_23], %23 {strides = array<i32>} : memref<2x8xf32, #tpu.memory_space<vmem>>, vector<2x8xf32>,
    return
  }
  func.func @transform_0(%arg0: i32) -> (i32, i32) {
    %c0_i32 = arith.constant 0 : i32
    %c0_i32_0 = arith.constant 0 : i32
    return %arg0, %c0_i32 : i32, i32
  }
  func.func @transform_1(%arg0: i32) -> (i32, i32) {
    %c0_i32 = arith.constant 0 : i32
    %c0_i32_0 = arith.constant 0 : i32
    return %arg0, %c0_i32 : i32, i32
  }
  func.func @transform_2(%arg0: i32) -> (i32, i32) {
    %c0_i32 = arith.constant 0 : i32
    %c0_i32_0 = arith.constant 0 : i32
    %c0_i32_1 = arith.constant 0 : i32
    return %c0_i32, %c0_i32_0 : i32, i32
  }
  func.func @transform_3(%arg0: i32) -> (i32, i32) {
    %c0_i32 = arith.constant 0 : i32
    %c0_i32_0 = arith.constant 0 : i32
    %c0_i32_1 = arith.constant 0 : i32
    return %c0_i32, %c0_i32_0 : i32, i32
  }
  func.func @transform_4(%arg0: i32) -> (i32, i32) {
    %c0_i32 = arith.constant 0 : i32
    %c0_i32_0 = arith.constant 0 : i32
    %c0_i32_1 = arith.constant 0 : i32
    return %c0_i32, %c0_i32_0 : i32, i32
  }
  func.func @transform_5(%arg0: i32) -> (i32, i32) {
    %c0_i32 = arith.constant 0 : i32
    %c0_i32_0 = arith.constant 0 : i32
    %c0_i32_1 = arith.constant 0 : i32
    return %c0_i32, %c0_i32_0 : i32, i32
  }
  func.func @transform_6(%arg0: i32) -> (i32, i32) {
    %c0_i32 = arith.constant 0 : i32
    %c0_i32_0 = arith.constant 0 : i32
    %c0_i32_1 = arith.constant 0 : i32
    return %c0_i32, %c0_i32_0 : i32, i32
  }
  func.func @transform_7(%arg0: i32) -> (i32, i32) {
    %c0_i32 = arith.constant 0 : i32
    %c0_i32_0 = arith.constant 0 : i32
    %c0_i32_1 = arith.constant 0 : i32
    return %c0_i32, %c0_i32_0 : i32, i32
  }
  func.func @transform_8(%arg0: i32) -> (i32, i32) {
    %c0_i32 = arith.constant 0 : i32
    %c0_i32_0 = arith.constant 0 : i32
    %c0_i32_1 = arith.constant 0 : i32
    return %c0_i32, %c0_i32_0 : i32, i32
  }
  func.func @transform_9(%arg0: i32) -> (i32, i32) {
    %c0_i32 = arith.constant 0 : i32
    %c0_i32_0 = arith.constant 0 : i32
    return %c0_i32, %arg0 : i32, i32
  }
}

</mosaic_0001>

<bundles_post_ra>
// kernel: double_q_critic_forward.1
= control target key start
LH: loop header
LB: loop body
LE: loop exit
PB: predicated region body
PF: predicated region fallthrough
CT: control target
= control target key end

     0   :  { %14 = vsyncpa [#allocation3], 0  ;;  %s473_s0 = inlined_call_operand.hbm [shape: f32[8,24], index: 0, kind: input, shape index: {}]   ;;  %s474_s1 = inlined_call_operand.hbm [shape: f32[8,8], index: 1, kind: input, shape index: {}]   ;;  %s475_s2 = inlined_call_operand.hbm [shape: f32[24,64], index: 2, kind: input, shape index: {}]   ;;  %s476_s3 = inlined_call_operand.hbm [shape: f32[8,64], index: 3, kind: input, shape index: {}]   ;;  %s477_s4 = inlined_call_operand.vmem [shape: f32[1,64], index: 4, kind: input, shape index: {}]   ;;  %s478_s5 = inlined_call_operand.hbm [shape: f32[64,64], index: 5, kind: input, shape index: {}]   ;;  %s479_s6 = inlined_call_operand.vmem [shape: f32[1,64], index: 6, kind: input, shape index: {}]   ;;  %s480_s7 = inlined_call_operand.vmem [shape: f32[2,64], index: 7, kind: input, shape index: {}]   ;;  %s481_s8 = inlined_call_operand.vmem [shape: f32[2,1], index: 8, kind: input, shape index: {}]   ;;  %s482_s9 = inlined_call_operand.vmem [shape: f32[2,8], index: 9, kind: output, shape index: {}]  }
   0x1   :  { %15 = vsyncpa [#allocation5], 0  ;;  %s33_s11 = sshll.u32 %s474_s1, 4  ;;  %s34_s11 = int_to_ptr.hbm [resolvable:$true] %s33_s11 }
   0x2   :  { %16 = vsyncpa [#allocation8], 0  ;;  %s385_s12 = smov [#allocation4]   ;;  %s57_s16 = sshll.u32 %s476_s3, 4  ;;  %s58_s16 = int_to_ptr.hbm [resolvable:$true] %s57_s16 }
   0x3   :  { %s35_s13 = sshll.u32 %s385_s12, 4  ;;  %s386_s17 = smov [#allocation7]   ;;  %s36_s13 = int_to_ptr.vmem [resolvable:$true] %s35_s13 }
   0x4   :  { %38 = dma.hbm_to_vmem [thread:$0]  %s34_s11, 128, %s36_s13, [#allocation5]  }
   0x5   :  { %s59_s18 = sshll.u32 %s386_s17, 4  ;;  %s22_s21 = sshll.u32 %s473_s0, 4  ;;  %s60_s18 = int_to_ptr.vmem [resolvable:$true] %s59_s18  ;;  %s23_s21 = int_to_ptr.hbm [resolvable:$true] %s22_s21 }
   0x6   :  { %62 = dma.hbm_to_vmem [thread:$0]  %s58_s16, 128, %s60_s18, [#allocation8]  }
   0x7   :  { %s43_s23 = sshll.u32 %s475_s2, 4  ;;  %s387_s24 = smov [#allocation2]   ;;  %s44_s23 = int_to_ptr.hbm [resolvable:$true] %s43_s23 }
   0x8   :  { %s24_s25 = sshll.u32 %s387_s24, 4  ;;  %s388_s3 = smov [#allocation6]   ;;  %s25_s25 = int_to_ptr.vmem [resolvable:$true] %s24_s25 }
   0x9   :  { %27 = dma.hbm_to_vmem [thread:$0]  %s23_s21, 128, %s25_s25, [#allocation3]  }
   0xa   :  { %s45_s26 = sshll.u32 %s388_s3, 4  ;;  %s389_s27 = smov 128   ;;  %s46_s26 = int_to_ptr.vmem [resolvable:$true] %s45_s26 }
   0xb   :  { %s390_s28 = smov 8   ;;  %s69_s30 = sshll.u32 %s478_s5, 4  ;;  %s70_s30 = int_to_ptr.hbm [resolvable:$true] %s69_s30 }
   0xc   :  { %51 = dma.hbm_to_vmem [thread:$0]  %s44_s23, 384, %s46_s26, [#allocation5], %s389_s27, %s389_s27, %s390_s28  }
   0xd   :  { %s391_s10 = smov [#allocation9]  }
   0xe   :  { %s71_s11 = sshll.u32 %s391_s10, 4  ;;  %s72_s11 = int_to_ptr.vmem [resolvable:$true] %s71_s11 }
   0xf   :  { %77 = dma.hbm_to_vmem [thread:$0]  %s70_s30, 1024, %s72_s11, [#allocation8], %s389_s27, %s389_s27, %s390_s28  }
  0x10   :  { %379 = dma.done.wait [#allocation3], 128  }
  0x11   :  { %380 = vsyncadd [#allocation3], 4294967168 }
  0x12   :  { %381 = dma.done.wait [#allocation5], 512  }
  0x13   :  { %382 = vsyncadd [#allocation5], 4294966784 }
  0x14   :  { %383 = dma.done.wait [#allocation8], 1152  }
  0x15   :  { %384 = vsyncadd [#allocation8], 4294966144  ;;  %vm110_vm0 = vcmask 64512   ;;  %v108_v0 = vld [vmem:[#allocation6 + $0x10] sm:$0xff]  ;;  %v107_v1 = vld [vmem:[#allocation6 + $0x8] sm:$0xff]  ;;  %vm134_vm1 = vcmask 195584  }
  0x16   :  { %v109_v2 = vld [vmem:[#allocation7] sm:$0xff]  ;;  %151 = vmatpush.msra.mxu1 %v108_v0  ;;  %v106_v4 = vld [vmem:[#allocation6] sm:$0xff]  ;;  %v170_v6 = vld [vmem:[#allocation9 + $0x30] sm:$0xff]  ;;  %vm176_vm2 = vcmask 523264   ;;  %v392_v21 = vmov 0   ;;  %vm234_vm3 = vcmask 58368  }
  0x17   :  { %129 = vmatpush.msra.mxu0 %v109_v2  ;;  %v105_v3 = vld [vmem:[#allocation4] sm:$0xff]  ;;  %v104_v7 = vld [vmem:[#allocation2] sm:$0xff]  ;;  %v169_v8 = vld [vmem:[#allocation9 + $0x28] sm:$0xff]  ;;  %256 = vset.pattern.permute.xlu0 %v392_v21 }
  0x18   :  { %243 = vmatmul.msk.f32.vlgmr.msra.gmra.mxu0 %vm110_vm0, %v105_v3  ;;  %v171_v5 = vld [vmem:[#allocation9 + $0x38] sm:$0xff]  ;;  %152 = vmatpush.msra.mxu1 %v107_v1  ;;  %v168_v9 = vld [vmem:[#allocation9 + $0x20] sm:$0xff]  ;;  %v166_v11 = vld [vmem:[#allocation9 + $0x10] sm:$0xff] }
  0x19   :  { %188 = vmatpush.msra.mxu2 %v171_v5  ;;  %v167_v10 = vld [vmem:[#allocation9 + $0x18] sm:$0xff]  ;;  %v165_v12 = vld [vmem:[#allocation9 + $0x8] sm:$0xff]  ;;  %v164_v13 = vld [vmem:[#allocation9] sm:$0xff] }
  0x1a   :  { %153 = vmatpush.msra.mxu1 %v106_v4  ;;  %v257_v15 = vld [vmem:[%s477_s4] ss:$0 sm:$0xff] }
  0x1b   :  { %189 = vmatpush.msra.mxu2 %v170_v6  ;;  %244 = vmatmul.msk.f32.vlgmr.msra.gmra.mxu1 %vm134_vm1, %v104_v7  ;;  %v202_v20 = vld [vmem:[%s481_s8] sm:$0x3] }
  0x1c   :  { %205 = vperm.xlu0 %256, %v202_v20   ;;  %v258_v22 = vld [vmem:[%s479_s6] ss:$0 sm:$0xff] }
  0x1d   :  { %190 = vmatpush.msra.mxu2 %v169_v8  ;;  %v201_v26 = vld [vmem:[%s480_s7] sm:$0x3] }
  0x1f   :  { %191 = vmatpush.msra.mxu2 %v168_v9 }
  0x21   :  { %192 = vmatpush.msra.mxu2 %v167_v10 }
  0x23   :  { %193 = vmatpush.msra.mxu2 %v166_v11 }
  0x25   :  { %194 = vmatpush.msra.mxu2 %v165_v12 }
  0x27   :  { %195 = vmatpush.msra.mxu2 %v164_v13 }
  0x8e   :  { %v206_v27 = vpop.permute.xlu0 %205 }
  0x95   :  { %v131_v14 = vpop.f32.mrf.mxu0 }
  0x98   :  { %v155_v16 = vpop.f32.mrf.mxu1 }
  0x99   :  { %v156_v17 = vadd.f32 %v155_v16, %v131_v14 }
  0x9b   :  { %v162_v18 = vadd.f32 %v257_v15, %v156_v17 }
  0x9d   :  { %v163_v19 = vmax.f32 %v162_v18, 0.0 }
  0x9f   :  { %245 = vmatmul.msk.f32.vlgmr.msra.gmra.mxu2 %vm176_vm2, %v163_v19 }
 0x122   :  { %v197_v23 = vpop.f32.mrf.mxu2 }
 0x123   :  { %v198_v24 = vadd.f32 %v258_v22, %v197_v23 }
 0x125   :  { %v200_v25 = vmax.f32 %v198_v24, 0.0 }
 0x127   :  { %246 = vmatpush.xpose.msk.msra.mxu3 %vm176_vm2, %v200_v25 }
 0x12a   :  { %247 = vmatmul.msk.f32.vlgmr.msra.gmra.mxu3 %vm176_vm2, %v201_v26 }
 0x1ad   :  { %v231_v28 = vpop.f32.mrf.mxu3 }
 0x1ae   :  { %v232_v29 = vadd.f32 %v231_v28, %v206_v27 }
 0x1b0   :  { %235 = vst.msk [vmem:[%s482_s9] sm:$0x3] %vm234_vm3, %v232_v29 }
 0x1b1   :  { %240 = vsyncpa [#allocation3], 1 }
 0x1b2   :  { %241 = vsyncpa [#allocation5], 1 }
 0x1b3   :  { %242 = vsyncpa [#allocation8], 1 }

</bundles_post_ra>
